<compile_context>
chip_gen: v7x
topology: tpu7x:2x2x1
jax: 0.10.0
libtpu: 0.0.40
codegen_flags: <defaults>
</compile_context>

<pallas_src>
import functools

import jax
import jax.numpy as jnp
from jax.experimental import pallas as pl
from jax.experimental.pallas import tpu as pltpu


def _weighted_ce_kernel(logits_ref, targets_ref, weights_ref, partial_ref, *,
                        tile_n, n):
    # logits_ref : (TILE_N, C)  native dtype (f32/bf16) in VMEM
    # targets_ref: (TILE_N, 1)  int32 in VMEM
    # weights_ref: (TILE_N, 1)  f32 in VMEM
    # partial_ref: (1, 8, 128)  f32 per-tile partial sum (lane-dense block)
    logits = logits_ref[...]                                    # native dtype
    targets = targets_ref[...]
    weights = weights_ref[...]
    c = logits.shape[-1]

    # Row max and target-class pick in the native dtype: both are exact
    # (max / compare / select + sum-of-one-nonzero), so no upfront full-tile
    # f32 upcast and no (T, C) int32 iota temporary.
    m = jnp.max(logits, axis=-1, keepdims=True)                 # (T, 1)

    class_ids = jax.lax.broadcasted_iota(jnp.int32, (1, c), 1)  # (1, C)
    picked = jnp.where(class_ids == targets, logits,
                       jnp.zeros((), logits.dtype))             # (T, C)
    target_logit = jnp.sum(picked, axis=-1, keepdims=True)      # (T, 1) exact

    # Numerically stable logsumexp: only the exp path runs in f32.
    m_f32 = m.astype(jnp.float32)
    shifted = logits.astype(jnp.float32) - m_f32                # (T, C) f32
    denom = jnp.sum(jnp.exp(shifted), axis=-1, keepdims=True)   # (T, 1)
    lse = m_f32 + jnp.log(denom)                                # (T, 1)
    per_row = lse - target_logit.astype(jnp.float32)            # (T, 1)

    # Mask rows past the true batch size (ragged last tile: OOB-padded rows
    # may contain garbage; the select makes them contribute exactly 0).
    row = jax.lax.broadcasted_iota(jnp.int32, (tile_n, 1), 0)
    global_row = pl.program_id(0) * tile_n + row
    contrib = jnp.where(global_row < n, weights * per_row, 0.0)

    tile_sum = jnp.sum(contrib)                                 # scalar
    # One lane-dense, (8,128)-aligned partial block per grid step keeps the
    # grid axis 'parallel' and the store unmasked. Wrapper reads [:, 0, 0].
    partial_ref[...] = jnp.broadcast_to(tile_sum, (1, 8, 128)).astype(
        jnp.float32)


def _round_up(x, m):
    return ((x + m - 1) // m) * m


def _sublane_align(itemsize):
    # Sublane packing tile: 8 rows for 4-byte, 16 for 2-byte, 32 for 1-byte.
    return 8 if itemsize >= 4 else (16 if itemsize == 2 else 32)


def _choose_tile_n(n, c, itemsize):
    """Pick batch-tile rows purely by byte budget (~4 MiB native logits)."""
    target_bytes = 4 * 1024 * 1024
    align = _sublane_align(itemsize)
    tile = max(align, (target_bytes // max(1, c * itemsize)) // align * align)
    # Keep at least 2 tiles so both v7x TensorCores get work (costs only one
    # extra ~0.35 us grid step on single-TC chips).
    if n > 2 * align:
        tile = min(tile, _round_up(-(-n // 2), align))
    tile = min(tile, _round_up(n, align))
    return max(align, tile)


def confidence_weighted_loss(outputs, targets, confidence_weights, *,
                             tile_n=None):
    """outputs: [N, C] float logits, targets: [N] int, weights: [N] float."""
    n, c = outputs.shape
    itemsize = jnp.dtype(outputs.dtype).itemsize
    align = _sublane_align(itemsize)
    if tile_n is None:
        tile_n = _choose_tile_n(n, c, itemsize)
    tile_n = max(align, _round_up(int(tile_n), align))
    tile_n = min(tile_n, _round_up(n, align))
    num_tiles = pl.cdiv(n, tile_n)

    # Tiny (N-element) side arrays: int32 targets, f32 weights.  The big
    # logits tensor passes through in its native dtype.
    targets2d = targets.astype(jnp.int32).reshape(n, 1)
    weights2d = confidence_weights.astype(jnp.float32).reshape(n, 1)

    partials = pl.pallas_call(
        functools.partial(_weighted_ce_kernel, tile_n=tile_n, n=n),
        out_shape=jax.ShapeDtypeStruct((num_tiles, 8, 128), jnp.float32),
        grid=(num_tiles,),
        in_specs=[
            pl.BlockSpec((tile_n, c), lambda i: (i, 0)),
            pl.BlockSpec((tile_n, 1), lambda i: (i, 0)),
            pl.BlockSpec((tile_n, 1), lambda i: (i, 0)),
        ],
        out_specs=pl.BlockSpec((1, 8, 128), lambda i: (i, 0, 0)),
        compiler_params=pltpu.CompilerParams(
            dimension_semantics=("parallel",),
            # 2x ~4 MiB pipeline buffers + a few (T,C) f32 temporaries; safe
            # on v5e/v6e (128 MiB physical) and v7x (64 MiB / TC).
            vmem_limit_bytes=48 * 1024 * 1024),
    )(outputs, targets2d, weights2d)

    # Finalize in plain JAX: sum the per-tile partials, divide by true N once.
    return jnp.sum(partials[:, 0, 0]) / jnp.float32(n)


def _reference(outputs, targets, confidence_weights):
    logp = jax.nn.log_softmax(outputs.astype(jnp.float32), axis=-1)
    per_sample = -jnp.take_along_axis(
        logp, targets.astype(jnp.int32)[:, None], axis=-1)[:, 0]
    return jnp.mean(per_sample * confidence_weights.astype(jnp.float32))


if __name__ == "__main__":
    key = jax.random.PRNGKey(0)
    k1, k2, k3 = jax.random.split(key, 3)

    batch = 20          # deliberately NOT a multiple of the tile alignment
    num_classes = 32

    outputs = jax.random.normal(k1, (batch, num_classes), dtype=jnp.float32)
    targets = jax.random.randint(k2, (batch,), 0, num_classes,
                                 dtype=jnp.int32)
    confidence_weights = jax.random.uniform(k3, (batch,), dtype=jnp.float32)

    ref = _reference(outputs, targets, confidence_weights)

    # 1) Forced tiny tile: 3-tile grid with a ragged last tile (exercises the
    #    pipelined + masked path at a small shape).
    loss_small_tile = confidence_weighted_loss(
        outputs, targets, confidence_weights, tile_n=8)
    loss_small_tile = jax.block_until_ready(loss_small_tile)
    assert jnp.allclose(loss_small_tile, ref, rtol=1e-5, atol=1e-5), (
        loss_small_tile, ref)

    # 2) Auto tile sizing (byte-budget tile, >=2 tiles, ragged last tile).
    loss_auto = confidence_weighted_loss(outputs, targets, confidence_weights)
    loss_auto = jax.block_until_ready(loss_auto)
    assert jnp.allclose(loss_auto, ref, rtol=1e-5, atol=1e-5), (loss_auto, ref)

    print("KERNEL_OK")
</pallas_src>

<mosaic_0001>
module attributes {stable_mosaic.version = 11 : i64} {
  func.func @_weighted_ce_kernel(%arg0: i32, %arg1: memref<8x32xf32, #tpu.memory_space<vmem>>, %arg2: memref<8x1xi32, #tpu.memory_space<vmem>>, %arg3: memref<8x1xf32, #tpu.memory_space<vmem>>, %arg4: memref<1x8x128xf32, #tpu.memory_space<vmem>>) attributes {dimension_semantics = [#tpu.dimension_semantics<parallel>], iteration_bounds = array<i64: 3>, scalar_prefetch = 0 : i64, scratch_operands = 0 : i64, tpu.core_type = #tpu.core_type<tc>, window_params = [{transform_indices = @transform_0, window_bounds = array<i64: 8, 32>}, {transform_indices = @transform_1, window_bounds = array<i64: 8, 1>}, {transform_indices = @transform_2, window_bounds = array<i64: 8, 1>}, {transform_indices = @transform_3, window_bounds = array<i64: 1, 8, 128>}]} {
    %c0 = arith.constant 0 : index
    %c0_0 = arith.constant 0 : index
    %0 = vector.load %arg1[%c0, %c0_0] : memref<8x32xf32, #tpu.memory_space<vmem>>, vector<8x32xf32>
    %c0_1 = arith.constant 0 : index
    %c0_2 = arith.constant 0 : index
    %1 = vector.load %arg2[%c0_1, %c0_2] : memref<8x1xi32, #tpu.memory_space<vmem>>, vector<8x1xi32>
    %c0_3 = arith.constant 0 : index
    %c0_4 = arith.constant 0 : index
    %2 = vector.load %arg3[%c0_3, %c0_4] : memref<8x1xf32, #tpu.memory_space<vmem>>, vector<8x1xf32>
    %cst = arith.constant dense<0xFF800000> : vector<8xf32>
    %3 = vector.multi_reduction <maximumf>, %0, %cst [1] : vector<8x32xf32> to vector<8xf32>
    %4 = vector.shape_cast %3 : vector<8xf32> to vector<8x1xf32>
    %5 = tpu.iota {dimensions = array<i32: 1>} : vector<1x32xi32>
    %6 = vector.broadcast %5 : vector<1x32xi32> to vector<8x32xi32>
    %7 = vector.broadcast %1 : vector<8x1xi32> to vector<8x32xi32>
    %8 = arith.cmpi eq, %6, %7 : vector<8x32xi32>
    %cst_5 = arith.constant 0.000000e+00 : f32
    %9 = vector.broadcast %cst_5 : f32 to vector<8x32xf32>
    %10 = arith.select %8, %0, %9 : vector<8x32xi1>, vector<8x32xf32>
    %cst_6 = arith.constant dense<0.000000e+00> : vector<8xf32>
    %11 = vector.multi_reduction <add>, %10, %cst_6 [1] : vector<8x32xf32> to vector<8xf32>
    %12 = vector.shape_cast %11 : vector<8xf32> to vector<8x1xf32>
    %13 = vector.broadcast %4 : vector<8x1xf32> to vector<8x32xf32>
    %14 = arith.subf %0, %13 : vector<8x32xf32>
    %15 = math.exp %14 : vector<8x32xf32>
    %cst_7 = arith.constant dense<0.000000e+00> : vector<8xf32>
    %16 = vector.multi_reduction <add>, %15, %cst_7 [1] : vector<8x32xf32> to vector<8xf32>
    %17 = vector.shape_cast %16 : vector<8xf32> to vector<8x1xf32>
    %18 = math.log %17 : vector<8x1xf32>
    %19 = arith.addf %4, %18 : vector<8x1xf32>
    %20 = arith.subf %19, %12 : vector<8x1xf32>
    %21 = tpu.iota {dimensions = array<i32: 0>} : vector<8x1xi32>
    %c8_i32 = arith.constant 8 : i32
    %22 = arith.muli %arg0, %c8_i32 : i32
    %23 = vector.broadcast %22 : i32 to vector<8x1xi32>
    %24 = arith.addi %23, %21 : vector<8x1xi32>
    %c20_i32 = arith.constant 20 : i32
    %25 = vector.broadcast %c20_i32 : i32 to vector<8x1xi32>
    %26 = arith.cmpi slt, %24, %25 : vector<8x1xi32>
    %27 = arith.mulf %2, %20 : vector<8x1xf32>
    %cst_8 = arith.constant 0.000000e+00 : f32
    %28 = vector.broadcast %cst_8 : f32 to vector<8x1xf32>
    %29 = arith.select %26, %27, %28 : vector<8x1xi1>, vector<8x1xf32>
    %30 = vector.shape_cast %29 : vector<8x1xf32> to vector<1x8x1xf32>
    %cst_9 = arith.constant dense<0.000000e+00> : vector<1xf32>
    %31 = vector.multi_reduction <add>, %30, %cst_9 [1, 2] : vector<1x8x1xf32> to vector<1xf32>
    %32 = vector.shape_cast %31 : vector<1xf32> to vector<1x1x1xf32>
    %33 = vector.extract %32[0, 0, 0] : f32 from vector<1x1x1xf32>
    %34 = vector.broadcast %33 : f32 to vector<1x8x128xf32>
    %c0_10 = arith.constant 0 : index
    %c0_11 = arith.constant 0 : index
    %c0_12 = arith.constant 0 : index
    %35 = vector.load %arg4[%c0_10, %c0_11, %c0_12] : memref<1x8x128xf32, #tpu.memory_space<vmem>>, vector<1x8x128xf32>
    tpu.vector_store %arg4[%c0_10, %c0_11, %c0_12], %34 {strides = array<i32>} : memref<1x8x128xf32, #tpu.memory_space<vmem>>, vector<1x8x128xf32>,
    return
  }
  func.func @transform_0(%arg0: i32) -> (i32, i32) {
    %c0_i32 = arith.constant 0 : i32
    %c0_i32_0 = arith.constant 0 : i32
    return %arg0, %c0_i32 : i32, i32
  }
  func.func @transform_1(%arg0: i32) -> (i32, i32) {
    %c0_i32 = arith.constant 0 : i32
    %c0_i32_0 = arith.constant 0 : i32
    return %arg0, %c0_i32 : i32, i32
  }
  func.func @transform_2(%arg0: i32) -> (i32, i32) {
    %c0_i32 = arith.constant 0 : i32
    %c0_i32_0 = arith.constant 0 : i32
    return %arg0, %c0_i32 : i32, i32
  }
  func.func @transform_3(%arg0: i32) -> (i32, i32, i32) {
    %c0_i32 = arith.constant 0 : i32
    %c0_i32_0 = arith.constant 0 : i32
    %c0_i32_1 = arith.constant 0 : i32
    return %arg0, %c0_i32, %c0_i32_0 : i32, i32, i32
  }
}

</mosaic_0001>

<bundles_post_ra>
// kernel: tpu_custom_call.1
= control target key start
LH: loop header
LB: loop body
LE: loop exit
PB: predicated region body
PF: predicated region fallthrough
CT: control target
= control target key end

     0   :  { %8 = vsyncpa [#allocation3], 0  ;;  %s606_s0 = inlined_call_operand.vmem [shape: f32[20,32], index: 0, kind: input, shape index: {}]   ;;  %s607_s1 = inlined_call_operand.vmem [shape: s32[20,1], index: 1, kind: input, shape index: {}]   ;;  %s608_s2 = inlined_call_operand.vmem [shape: f32[20,1], index: 2, kind: input, shape index: {}]   ;;  %s609_s3 = inlined_call_operand.hbm [shape: f32[3,8,128], index: 3, kind: output, shape index: {}]  }
   0x1   :  { %10 = vsyncpa [#allocation3 + $0x1], 0  ;;  %s491_s12 = smov 0   ;;  %s493_s13 = smov 0  }
   0x2   :  { %s495_s14 = smov 0   ;;  %s497_s15 = smov 0  }
   0x3 LB: > { %s512_s16 = sadd.s32 4294967295, %s467_s15   ;;  %s345_s17 = sadd.s32 4294967294, %s467_s15   ;;  %s467_s15 = sphi %s497_s15, %s615_s15   ;;  %s463_s14 = sphi %s495_s14, %s614_s14   ;;  %s459_s13 = sphi %s493_s13, %s613_s13   ;;  %s455_s12 = sphi %s491_s12, %s612_s12  }
   0x4   : > { %s516_s18 = sadd.s32 1, %s467_s15   ;;  %s101_s19 = sadd.s32 1, %s463_s14 }
   0x5   : > { %s98_s20 = ssub.s32 %s467_s15, %s516_s18  ;;  %p111_p0 = scmp.ne.s32.totalorder %s463_s14, %s459_s13 }
   0x6   : > { %p99_p1 = scmp.eq.s32.totalorder %s98_s20, 0  ;;  %p112_p2 = scmp.eq.s32.totalorder %s512_s16, 2 }
   0x7   : > { %p117_p3 = scmp.ne.s32.totalorder %s459_s13, %s455_s12  ;;  %p118_p4 = scmp.eq.s32.totalorder %s345_s17, 2 }
   0x8   : > { %s527_s21 = scalar_select %p99_p1, %s463_s14, %s101_s19  }
   0x9   : > { %p529_p5 = por %p112_p2, %p111_p0  ;;  %p533_p6 = por %p118_p4, %p117_p3 }
   0xa   : > { %p348_p7 = scmp.ge.s32.totalorder %s467_s15, 1  ;;  %p157_p8 = scmp.lt.s32.totalorder %s467_s15, 4 }
   0xc   : > { %p158_p9 = pnand %p348_p7, %p157_p8 }
   0xd   : > { %p188_p10 = scmp.lt.s32.totalorder (!%p158_p9), %s512_s16, 2  ;;  %v469_v0 = vmov (!%p158_p9), 0   ;;  %vm203_vm0 = vcmask (!%p158_p9), 261120   ;;  %v207_v7 = vlaneseq (!%p158_p9)  ;;  %s353_s5 = sshll.u32 (!%p158_p9), %s512_s16, 3  ;;  %vm235_vm3 = vcmask (!%p158_p9), 7168  }
   0xe   : > { %161 = sbr.rel (%p158_p9) target bundleno = 567 (0x237), region = 32  ;;  %400 = vset.pattern.permute.xlu0 (!%p158_p9), %v469_v0  ;;  %v230_v16 = vstv (!%p158_p9), %s353_s5  ;;  %s185_s9 = sand.u32 (!%p158_p9), 1, %s459_s13  }
   0xf   : > { %v208_v8 = vand.u32 (!%p158_p9), 127, %v207_v7  ;;  %v228_v15 = vshrl.u32 (!%p158_p9), %v207_v7, 7  ;;  %s349_s10 = sshll.u32 (!%p158_p9), %s185_s9, 3  ;;  %s355_s19 = sshll.u32 (!%p158_p9), %s512_s16, 7 }
  0x10   : > { %s187_s11 = scalar_lea.vmem (!%p158_p9), [#allocation2], %s349_s10  ;;  %s566_s26 = scalar_lea.hbm (!%p158_p9), %s609_s3, %s355_s19 }
  0x11   : > { %v231_v20 = vadd.s32 (!%p158_p9), %v230_v16, %v228_v15  ;;  %s262_s17 = sshll.u32 (!%p158_p9), %s187_s11, 4  ;;  %s249_s27 = scalar_lea.sflag (!%p158_p9), [#allocation3], %s185_s9  ;;  %s561_s17 = int_to_ptr.vmem [resolvable:$true] %s262_s17 }
  0x13   : > { %vm232_vm2 = vcmp.lt.s32.totalorder (!%p158_p9), %v231_v20, 20 }
  0x15   : > { %s189_s24 = scalar_select %p188_p10, %s512_s16, 2 }
  0x16   : > { %s470_s16 = smov [#allocation2]  }
  0x17   : > { %s541_s25 = sshll.u32 %s189_s24, 3  ;;  %s409_s29 = sshll.u32 %s470_s16, 4  ;;  %s410_s29 = int_to_ptr.vmem [resolvable:$false] %s409_s29 }
  0x18   : > { %s191_s28 = scalar_lea.vmem %s606_s0, %s541_s25  ;;  %s195_s4 = scalar_lea.vmem %s607_s1, %s541_s25 }
  0x19   : > { %v200_v1 = vld [vmem:[%s191_s28] sm:$0xff]  ;;  %s199_s8 = scalar_lea.vmem %s608_s2, %s541_s25  ;;  %s405_s28 = scalar_lea.vmem %s561_s17, 128 }
  0x1a   : > { %v204_v2 = vsel %vm203_vm0, %v200_v1, -inf  ;;  %v201_v3 = vld [vmem:[%s195_s4] sm:$0xff]  ;;  %p406_p11 = scmp.ne.s32.totalorder %s561_s17, %s405_s28  ;;  %s411_s30 = scalar_lea.vmem %s410_s29, 256 }
  0x1b   : > { %205 = vmax.xlane.f32.xlu0 %v204_v2  ;;  %v202_v22 = vld [vmem:[%s199_s8] sm:$0xff]  ;;  %p412_p0 = scmp.lt.s32.totalorder %s561_s17, %s410_s29  ;;  %p413_p1 = scmp.lt.s32.totalorder %s411_s30, %s405_s28 }
  0x1c   : > { %p407_p12 = pnand %p406_p11, %p529_p5 }
  0x1d   : > { %p414_p2 = por %p413_p1, %p412_p0 }
  0x1e   : > { %p408_p13 = pneg %p407_p12 }
  0x20   : > { %p415_p3 = pnand %p414_p2, %p408_p13 }
  0x31   : > { %210 = vperm.xlu0 %400, %v201_v3  }
  0xa8   : > { %v206_v4 = vpop.xlane.xlu0 %205 }
  0xa9   : > { %v217_v5 = vsub.f32 %v200_v1, %v206_v4 }
  0xab   : > { %v218_v6 = vmul.f32 1.442695, %v217_v5 }
  0xad   : > { %401 = vpow2.f32 %v218_v6 }
  0xb0   : > { %v211_v9 = vpop.permute.xlu0 %210 }
  0xb1   : > { %vm212_vm1 = vcmp.eq.s32.totalorder %v208_v8, %v211_v9 }
  0xb2   : > { %v213_v11 = vsel %vm212_vm1, %v200_v1, 0.0 }
  0xb3   : > { %v214_v13 = vsel %vm203_vm0, %v213_v11, 0.0 }
  0xb7   : > { %v402_v10 = vpop.eup %401 }
  0xb8   : > { %v220_v12 = vsel %vm203_vm0, %v402_v10, 0.0 }
  0xb9   : > { %221 = vadd.xlane.f32.xlu1 %v220_v12 }
  0xbd   : > { %215 = vadd.xlane.f32.xlu1 %v214_v13 }
 0x146   : > { %v222_v14 = vpop.xlane.xlu1 %221 }
 0x147   : > { %403 = vlog2.f32 %v222_v14 }
 0x14a   : > { %v216_v19 = vpop.xlane.xlu1 %215 }
 0x151   : > { %v404_v17 = vpop.eup %403 }
 0x152   : > { %v224_v18 = vmul.f32 0.6931472, %v404_v17 }
 0x154   : > { %v225_v21 = vadd.f32 %v224_v18, %v206_v4 }
 0x156   : > { %v226_v23 = vsub.f32 %v225_v21, %v216_v19 }
 0x158   : > { %v233_v24 = vmul.f32 %v226_v23, %v202_v22 }
 0x15a   : > { %v234_v25 = vsel %vm232_vm2, %v233_v24, 0.0 }
 0x15b   : > { %v236_v26 = vsel %vm235_vm3, %v234_v25, 0.0 }
 0x15c   : > { %237 = vadd.xlane.f32.xlu1 %v236_v26 }
 0x1e9   : > { %v238_v27 = vpop.xlane.xlu1 %237 }
 0x1ea   : > { %v239_v28 = vrot.slane %v238_v27, 4 }
 0x1ec   : > { %v240_v29 = vadd.f32 %v239_v28, %v238_v27 }
 0x1ee   : > { %v241_v30 = vrot.slane %v240_v29, 2 }
 0x1f0   : > { %v242_v31 = vadd.f32 %v241_v30, %v240_v29 }
 0x1f2   : > { %v243_v32 = vrot.slane %v242_v31, 1 }
 0x1f4   : > { %v244_v33 = vadd.f32 %v243_v32, %v242_v31 }
 0x1f6   : > { %358 = vpush %v244_v33 }
 0x227   : > { %s359_s20 = spop %358 }
 0x228   : > { %v246_v34 = vstv %s359_s20 }
 0x229   : > { %247 = vst [vmem:[%s187_s11] sm:$0xff] %v246_v34 }
 0x22a   : > { %418 = shalt.err (!%p415_p3)
}
 0x22b   : > { %s419_s4 = scalar_lea.hbm %s566_s26, 128  ;;  %s423_s7 = scalar_lea.hbm %s609_s3, 384 }
 0x22c   : > { %p420_p4 = scmp.ne.s32.totalorder %s566_s26, %s419_s4  ;;  %p424_p9 = scmp.lt.u32.totalorder %s566_s26, %s609_s3 }
 0x22d   : > { %p425_p10 = scmp.lt.u32.totalorder %s423_s7, %s419_s4  ;;  %p427_p12 = scmp.lt.u32.totalorder %s419_s4, %s566_s26 }
 0x22e   : > { %p421_p7 = pnand %p420_p4, %p529_p5 }
 0x22f   : > { %p426_p11 = por %p425_p10, %p424_p9 }
 0x230   : > { %p422_p8 = pneg %p421_p7 }
 0x231   : > { %p428_p13 = por %p427_p12, %p426_p11 }
 0x233   : > { %p429_p0 = pnand %p428_p13, %p422_p8 }
 0x235   : > { %432 = shalt.err (!%p429_p0)
}
 0x236   : > { %360 = dma.vmem_to_hbm [thread:$0]  (%p529_p5), %s561_s17, 128, %s566_s26, %s249_s27  }
 0x237 PF: > { %p366_p1 = scmp.ge.s32.totalorder %s467_s15, 2  ;;  %s274_s10 = sand.u32 1, %s455_s12  }
 0x238   : > { %s275_s11 = scalar_lea.sflag [#allocation3], %s274_s10 }
 0x239   : > { %p363_p2 = pnand %p366_p1, %p533_p6 }
 0x23b   : > { %450 = dma.done.wait (!%p363_p2), %s275_s11, 128  }
 0x23c   : > { %452 = vsyncadd (!%p363_p2), %s275_s11, 4294967168  ;;  %p13_p3 = scmp.ge.s32.totalorder %s516_s18, 5   ;;  %s612_s12 = smov %s459_s13 }
 0x23d   : > { %s613_s13 = smov %s463_s14  ;;  %s614_s14 = smov %s527_s21 }
 0x23e   : > { %s615_s15 = smov %s516_s18  ;;  %15 = sbr.rel (!%p13_p3) target bundleno = 3 (0x3), region = 73 }
 0x245   :  { %280 = vsyncpa [#allocation3], 1 }
 0x246   :  { %282 = vsyncpa [#allocation3 + $0x1], 1 }

</bundles_post_ra>
